<compile_context>
chip_gen: v6e
topology: v6e:2x2x1
jax: 0.10.0
libtpu: 0.0.40
codegen_flags: <defaults>
</compile_context>

<pallas_src>
import functools
import math

import jax
import jax.numpy as jnp
from jax.experimental import pallas as pl
from jax.experimental.pallas import tpu as pltpu


_VMEM_LIMIT = 48 * 1024 * 1024  # fits inside v7x's 64 MiB physical VMEM


def _cparams(*sem):
    return pltpu.CompilerParams(dimension_semantics=sem, vmem_limit_bytes=_VMEM_LIMIT)


# ----------------------------------------------------------------------------
# Kernel 1: fused Frobenius norms + (||x1||/||x2||) * x2
# ----------------------------------------------------------------------------

def _norm_scale_kernel(x1_ref, x2_ref, o_ref, acc_ref):
    p = pl.program_id(0)   # phase: 0 = accumulate sums of squares, 1 = scale x2
    i = pl.program_id(1)   # row-block

    @pl.when((p == 0) & (i == 0))
    def _init():
        acc_ref[0] = jnp.float32(0.0)
        acc_ref[1] = jnp.float32(0.0)

    @pl.when(p == 0)
    def _accumulate():
        v1 = x1_ref[...].astype(jnp.float32)
        v2 = x2_ref[...].astype(jnp.float32)
        acc_ref[0] += jnp.sum(v1 * v1)
        acc_ref[1] += jnp.sum(v2 * v2)
        # NOTE: no o_ref store here.  The output index_map pins the output block to
        # block 0 for the whole of phase 0, so no garbage is ever DMA'd back to HBM.

    @pl.when(p == 1)
    def _scale():
        # matches torch: (norm(x1) / norm(x2)) * x2   (no epsilon, like the reference)
        s = jnp.sqrt(acc_ref[0]) * jax.lax.rsqrt(acc_ref[1])
        o_ref[...] = (x2_ref[...].astype(jnp.float32) * s).astype(o_ref.dtype)


def norm_match_scale(x1, x2):
    shape = x1.shape
    total = x1.size
    lanes = shape[-1]
    for cand in (1024, 512, 256, 128):
        if total % cand == 0:
            lanes = cand
            break
    rows = total // lanes
    a = x1.reshape(rows, lanes)
    b = x2.reshape(rows, lanes)
    rt_cap = max(8, (512 * 1024) // lanes)      # ~2 MiB f32 blocks
    rt = math.gcd(rows, rt_cap)
    if rt % 8 != 0:
        rt = rows
    nblk = rows // rt
    out = pl.pallas_call(
        _norm_scale_kernel,
        grid=(2, nblk),
        out_shape=jax.ShapeDtypeStruct((rows, lanes), x2.dtype),
        in_specs=[
            pl.BlockSpec((rt, lanes), lambda p, i: (i * (1 - p), 0)),  # x1 idle in phase 1
            pl.BlockSpec((rt, lanes), lambda p, i: (i, 0)),
        ],
        out_specs=pl.BlockSpec((rt, lanes), lambda p, i: (i * p, 0)),  # resident in phase 0
        scratch_shapes=[pltpu.SMEM((2,), jnp.float32)],
        # Must stay sequential (single core): phase 1 reads the SMEM accumulator.
        compiler_params=_cparams("arbitrary", "arbitrary"),
    )(a, b)
    return out.reshape(shape)


# ----------------------------------------------------------------------------
# Kernel 2: Haar analysis / synthesis as constant-matrix MXU matmuls on NCHW planes
# ----------------------------------------------------------------------------

def _haar_matrices(h, w):
    h2, w2 = h // 2, w // 2
    cw = jnp.arange(w)
    sgn_w = jnp.where(cw % 2 == 0, 1.0, -1.0).astype(jnp.float32)
    sp = (cw[:, None] // 2 == jnp.arange(w2)[None, :]).astype(jnp.float32)   # (w, w2)
    sm = sp * sgn_w[:, None]
    rh = jnp.arange(h)
    sgn_h = jnp.where(rh % 2 == 0, 1.0, -1.0).astype(jnp.float32)
    rp = (jnp.arange(h2)[:, None] == rh[None, :] // 2).astype(jnp.float32)   # (h2, h)
    rm = rp * sgn_h[None, :]
    return sp, sm, rp, rm


def _haar_inv_matrices(h, w):
    h2, w2 = h // 2, w // 2
    rh = jnp.arange(h)
    on_pair = rh[:, None] // 2 == jnp.arange(h2)[None, :]
    er = (on_pair & (rh[:, None] % 2 == 0)).astype(jnp.float32)              # (h, h2)
    orr = (on_pair & (rh[:, None] % 2 == 1)).astype(jnp.float32)             # (h, h2)
    cw = jnp.arange(w)
    cp = (jnp.arange(w2)[:, None] == cw[None, :] // 2).astype(jnp.float32)   # (w2, w)
    cm = cp * jnp.where(cw % 2 == 0, 1.0, -1.0).astype(jnp.float32)[None, :]
    return er, orr, cp, cm


def _haar_fwd_pair_kernel(x1_ref, x2_ref, sp_ref, sm_ref, rp_ref, rm_ref,
                          xc1_ref, xd1_ref, xc2_ref, xd2_ref):
    sp, sm, rp, rm = sp_ref[...], sm_ref[...], rp_ref[...], rm_ref[...]

    def analyse(x, xc_ref, xd_ref):
        cs = jnp.dot(x, sp, preferred_element_type=jnp.float32)   # pairwise col sums
        cd = jnp.dot(x, sm, preferred_element_type=jnp.float32)   # pairwise col diffs
        xc_ref[0, 0] = (0.25 * jnp.dot(rp, cs, preferred_element_type=jnp.float32)
                        ).astype(xc_ref.dtype)                    # LL
        xd_ref[0, 0] = (0.25 * jnp.dot(rm, cs, preferred_element_type=jnp.float32)
                        ).astype(xd_ref.dtype)                    # LH
        xd_ref[0, 1] = (0.25 * jnp.dot(rp, cd, preferred_element_type=jnp.float32)
                        ).astype(xd_ref.dtype)                    # HL
        xd_ref[0, 2] = (0.25 * jnp.dot(rm, cd, preferred_element_type=jnp.float32)
                        ).astype(xd_ref.dtype)                    # HH

    analyse(x1_ref[0, 0].astype(jnp.float32), xc1_ref, xd1_ref)
    analyse(x2_ref[0, 0].astype(jnp.float32), xc2_ref, xd2_ref)


def haar_forward_pair(x1, x2):
    """waveletDecomp.forward (stride 2, /2) of x1 and x2 in one fused call, emitted
    directly as split (xc, xd) tensors (xd channel order per input ch: LH, HL, HH)."""
    n, c, h, w = x1.shape
    h2, w2 = h // 2, w // 2
    sp, sm, rp, rm = _haar_matrices(h, w)
    img_spec = pl.BlockSpec((1, 1, h, w), lambda i, j: (i, j, 0, 0))
    xc_spec = pl.BlockSpec((1, 1, h2, w2), lambda i, j: (i, j, 0, 0))
    xd_spec = pl.BlockSpec((1, 3, h2, w2), lambda i, j: (i, j, 0, 0))
    xc1, xd1, xc2, xd2 = pl.pallas_call(
        _haar_fwd_pair_kernel,
        grid=(n, c),
        out_shape=(
            jax.ShapeDtypeStruct((n, c, h2, w2), x1.dtype),
            jax.ShapeDtypeStruct((n, 3 * c, h2, w2), x1.dtype),
            jax.ShapeDtypeStruct((n, c, h2, w2), x2.dtype),
            jax.ShapeDtypeStruct((n, 3 * c, h2, w2), x2.dtype),
        ),
        in_specs=[
            img_spec,
            img_spec,
            pl.BlockSpec((w, w2), lambda i, j: (0, 0)),
            pl.BlockSpec((w, w2), lambda i, j: (0, 0)),
            pl.BlockSpec((h2, h), lambda i, j: (0, 0)),
            pl.BlockSpec((h2, h), lambda i, j: (0, 0)),
        ],
        out_specs=(xc_spec, xd_spec, xc_spec, xd_spec),
        compiler_params=_cparams("parallel", "parallel"),
    )(x1, x2, sp, sm, rp, rm)
    return xc1, xd1, xc2, xd2


def _haar_inv_kernel(xc_ref, xd_ref, er_ref, or_ref, cp_ref, cm_ref, out_ref):
    ll = xc_ref[0, 0].astype(jnp.float32)
    lh = xd_ref[0, 0].astype(jnp.float32)
    hl = xd_ref[0, 1].astype(jnp.float32)
    hh = xd_ref[0, 2].astype(jnp.float32)
    cp = cp_ref[...]
    cm = cm_ref[...]
    even = (jnp.dot(ll + lh, cp, preferred_element_type=jnp.float32)
            + jnp.dot(hl + hh, cm, preferred_element_type=jnp.float32))   # even rows
    odd = (jnp.dot(ll - lh, cp, preferred_element_type=jnp.float32)
           + jnp.dot(hl - hh, cm, preferred_element_type=jnp.float32))    # odd rows
    x = (jnp.dot(er_ref[...], even, preferred_element_type=jnp.float32)
         + jnp.dot(or_ref[...], odd, preferred_element_type=jnp.float32))
    out_ref[0, 0] = x.astype(out_ref.dtype)


def haar_inverse_merge(xc, xd):
    """waveletDecomp.inverse (stride 2, *2) consuming the split (xc, xd) layout
    directly (replaces waveletcoeffmerge + inverse)."""
    n, c, h2, w2 = xc.shape
    h, w = 2 * h2, 2 * w2
    er, orr, cp, cm = _haar_inv_matrices(h, w)
    return pl.pallas_call(
        _haar_inv_kernel,
        grid=(n, c),
        out_shape=jax.ShapeDtypeStruct((n, c, h, w), xc.dtype),
        in_specs=[
            pl.BlockSpec((1, 1, h2, w2), lambda i, j: (i, j, 0, 0)),
            pl.BlockSpec((1, 3, h2, w2), lambda i, j: (i, j, 0, 0)),
            pl.BlockSpec((h, h2), lambda i, j: (0, 0)),
            pl.BlockSpec((h, h2), lambda i, j: (0, 0)),
            pl.BlockSpec((w2, w), lambda i, j: (0, 0)),
            pl.BlockSpec((w2, w), lambda i, j: (0, 0)),
        ],
        out_specs=pl.BlockSpec((1, 1, h, w), lambda i, j: (i, j, 0, 0)),
        compiler_params=_cparams("parallel", "parallel"),
    )(xc, xd, er, orr, cp, cm)


# ----------------------------------------------------------------------------
# Kernel 3: fused 2-layer conv (PUNet stand-in) + residual, tap-stacked matmuls
# ----------------------------------------------------------------------------

def _punet_kernel(xa_ref, xb_ref, w1_ref, b1_ref, w2_ref, b2_ref, mask_ref,
                  o_ref, pa_ref, pb_ref, ph_ref, st_ref, *, k, h, w):
    hw = h * w
    pz = k // 2
    interior = pz * w + pz              # flat offset of pixel (0,0) in the padded plane
    ca = xa_ref.shape[1]
    cb = xb_ref.shape[1]
    fch = b1_ref.shape[0]
    cin = ca + cb
    ls = pa_ref.shape[1]

    # Re-zero only the constant pad fringe each step (cheap, and megacore-safe:
    # scratch is per-core and `program_id == 0` may never run on the 2nd core).
    for ref in (pa_ref, pb_ref, ph_ref):
        nch = ref.shape[0]
        ref[:, 0:interior] = jnp.zeros((nch, interior), jnp.float32)
        ref[:, interior + hw:ls] = jnp.zeros((nch, ls - interior - hw), jnp.float32)

    xa = xa_ref[0].astype(jnp.float32)                          # (ca, hw)
    pa_ref[:, interior:interior + hw] = xa
    pb_ref[:, interior:interior + hw] = xb_ref[0].astype(jnp.float32)

    # ---- conv1: in-VMEM im2col over the k*k taps, then ONE MXU matmul ----
    for t in range(k * k):
        j = t % k
        off = (t // k) * w + j
        va = pa_ref[:, off:off + hw]
        vb = pb_ref[:, off:off + hw]
        if j != pz:                      # zero taps that fall outside the image width
            m = mask_ref[j:j + 1, :]
            va = va * m
            vb = vb * m
        st_ref[t * cin:t * cin + ca, :] = va
        st_ref[t * cin + ca:(t + 1) * cin, :] = vb

    hid = jnp.dot(w1_ref[...], st_ref[0:k * k * cin, :],
                  preferred_element_type=jnp.float32) + b1_ref[...]
    ph_ref[:, interior:interior + hw] = jnp.maximum(hid, 0.0)

    # ---- conv2 ----
    for t in range(k * k):
        j = t % k
        off = (t // k) * w + j
        vh = ph_ref[:, off:off + hw]
        if j != pz:
            vh = vh * mask_ref[j:j + 1, :]
        st_ref[t * fch:(t + 1) * fch, :] = vh

    y = jnp.dot(w2_ref[...], st_ref[0:k * k * fch, :],
                preferred_element_type=jnp.float32) + b2_ref[...]

    # fused residual: out = xa + PUNet(concat(xa, xb))
    o_ref[0] = (xa + y).astype(o_ref.dtype)


def punet_residual(pp, xa, xb):
    """Returns xa + PUNet(concat(xa, xb)); PUNet stand-in = conv3x3 -> f_ch, ReLU,
    conv3x3 -> ca.  One grid step per batch element ("parallel" -> megacore)."""
    n, ca, h, w = xa.shape
    cb = xb.shape[1]
    w1, b1, w2, b2 = pp["w1"], pp["b1"], pp["w2"], pp["b2"]
    fch, cout, k = w1.shape[0], w2.shape[0], w1.shape[2]
    assert cout == ca and k % 2 == 1
    pz = k // 2
    cin = ca + cb
    k2 = k * k
    kin1, kin2 = k2 * cin, k2 * fch
    hw = h * w
    ls = (((h + 2 * pz) * w + 2 * pz + 127) // 128) * 128      # lane-padded plane length

    w1m = jnp.transpose(w1, (0, 2, 3, 1)).reshape(fch, kin1).astype(jnp.float32)
    w2m = jnp.transpose(w2, (0, 2, 3, 1)).reshape(cout, kin2).astype(jnp.float32)
    b1c = b1.reshape(fch, 1).astype(jnp.float32)
    b2c = b2.reshape(cout, 1).astype(jnp.float32)

    col = jnp.arange(hw) % w
    masks = jnp.stack(
        [((col + j - pz >= 0) & (col + j - pz < w)) for j in range(k)]
    ).astype(jnp.float32)                                      # (k, hw)

    xa_f = xa.reshape(n, ca, hw)      # free reshape: lane-dense (C, H*W) slabs
    xb_f = xb.reshape(n, cb, hw)

    kern = functools.partial(_punet_kernel, k=k, h=h, w=w)
    out = pl.pallas_call(
        kern,
        grid=(n,),
        out_shape=jax.ShapeDtypeStruct((n, ca, hw), xa.dtype),
        in_specs=[
            pl.BlockSpec((1, ca, hw), lambda i: (i, 0, 0)),
            pl.BlockSpec((1, cb, hw), lambda i: (i, 0, 0)),
            pl.BlockSpec((fch, kin1), lambda i: (0, 0)),
            pl.BlockSpec((fch, 1), lambda i: (0, 0)),
            pl.BlockSpec((cout, kin2), lambda i: (0, 0)),
            pl.BlockSpec((cout, 1), lambda i: (0, 0)),
            pl.BlockSpec((k, hw), lambda i: (0, 0)),
        ],
        out_specs=pl.BlockSpec((1, ca, hw), lambda i: (i, 0, 0)),
        scratch_shapes=[
            pltpu.VMEM((ca, ls), jnp.float32),                 # H-padded xa plane
            pltpu.VMEM((cb, ls), jnp.float32),                 # H-padded xb plane
            pltpu.VMEM((fch, ls), jnp.float32),                # H-padded hidden plane
            pltpu.VMEM((max(kin1, kin2), hw), jnp.float32),    # reused im2col operand
        ],
        compiler_params=_cparams("parallel"),
    )(xa_f, xb_f, w1m, b1c, w2m, b2c, masks)
    # TODO(synk): for very large H*W, row-tile the image (pz-row halo) per grid step
    # to bound the per-step VMEM footprint (matters first on v7x's 64 MiB VMEM).
    return out.reshape(n, ca, h, w)


# ----------------------------------------------------------------------------
# Sub-networks / glue
# ----------------------------------------------------------------------------

def invnet_forward(xc, xd):
    # TODO(synk): invNet class definition not provided in the reference; identity.
    return xc, xd


def invnet_inverse(xc, xd):
    # TODO(synk): invNet class definition not provided in the reference; identity.
    return xc, xd


# ----------------------------------------------------------------------------
# proxInvExclThreNetms forward
# ----------------------------------------------------------------------------

def prox_inv_excl_thre_net_ms(params, x1, x2, *, scale, fxin):
    del fxin  # channel bookkeeping is handled by the kernel output layouts
    x2 = norm_match_scale(x1, x2)

    xd1 = []
    x1c, x2c = x1, x2
    for i in range(scale):
        x1c, x1d, x2c, x2d = haar_forward_pair(x1c, x2c)
        x1c, x1d = invnet_forward(x1c, x1d)
        x2c, x2d = invnet_forward(x2c, x2d)
        # Thresholding network (residual fused into the kernel)
        x1d = punet_residual(params["thre"][i], x1d, x2d)
        xd1.append(x1d)
        if i == scale - 1:
            x1c = punet_residual(params["thre"][scale], x1c, x2c)

    for i in reversed(range(scale)):
        x1c, x1d = invnet_inverse(x1c, xd1[i])
        x1c = haar_inverse_merge(x1c, x1d)

    # TODO(synk): PyTorch bilinear-upsamples if shapes mismatch; with spatial dims
    # divisible by 2**scale the shapes always match, so it is omitted.
    return x1c


# ----------------------------------------------------------------------------
# Deterministic parameter init
# ----------------------------------------------------------------------------

def _conv_init(key, cout, cin, k):
    kw, kb = jax.random.split(key)
    fan_in = cin * k * k
    w = jax.random.normal(kw, (cout, cin, k, k), jnp.float32) * (0.1 / jnp.sqrt(fan_in))
    b = jax.random.normal(kb, (cout,), jnp.float32) * 0.01
    return w, b


def init_params(key, scale, fxin, fch, fsz):
    thre = []
    keys = jax.random.split(key, scale + 1)
    for i in range(scale):
        ka, kb = jax.random.split(keys[i])
        w1, b1 = _conv_init(ka, fch, fxin * 3 * 2, fsz)
        w2, b2 = _conv_init(kb, fxin * 3, fch, fsz)
        thre.append({"w1": w1, "b1": b1, "w2": w2, "b2": b2})
    ka, kb = jax.random.split(keys[scale])
    w1, b1 = _conv_init(ka, fch, fxin * 1 * 2, fsz)
    w2, b2 = _conv_init(kb, fxin * 1, fch, fsz)
    thre.append({"w1": w1, "b1": b1, "w2": w2, "b2": b2})
    return {"thre": thre}


# ----------------------------------------------------------------------------
# Main
# ----------------------------------------------------------------------------

if __name__ == "__main__":
    key = jax.random.PRNGKey(0)
    N, fxin, H, W = 2, 4, 16, 16
    scale, fch, fsz = 2, 16, 3

    ka, kb, kp = jax.random.split(key, 3)
    x1 = jax.random.normal(ka, (N, fxin, H, W), jnp.float32)
    x2 = jax.random.normal(kb, (N, fxin, H, W), jnp.float32)
    params = init_params(kp, scale, fxin, fch, fsz)

    # Self-check: the Haar analysis/synthesis kernels are exact inverses.
    xc, xd, _, _ = haar_forward_pair(x1, x1)
    rec = haar_inverse_merge(xc, xd)
    assert float(jnp.max(jnp.abs(rec - x1))) < 1e-4, "haar round-trip failed"

    fwd = jax.jit(functools.partial(prox_inv_excl_thre_net_ms, scale=scale, fxin=fxin))
    out = jax.block_until_ready(fwd(params, x1, x2))
    assert out.shape == x1.shape, (out.shape, x1.shape)
    assert bool(jnp.all(jnp.isfinite(out)))
    print("KERNEL_OK")
</pallas_src>

<mosaic_0001>
module attributes {stable_mosaic.version = 11 : i64} {
  func.func @_haar_fwd_pair_kernel(%arg0: i32, %arg1: i32, %arg2: memref<1x1x16x16xf32, #tpu.memory_space<vmem>>, %arg3: memref<1x1x16x16xf32, #tpu.memory_space<vmem>>, %arg4: memref<16x8xf32, #tpu.memory_space<vmem>>, %arg5: memref<16x8xf32, #tpu.memory_space<vmem>>, %arg6: memref<8x16xf32, #tpu.memory_space<vmem>>, %arg7: memref<8x16xf32, #tpu.memory_space<vmem>>, %arg8: memref<1x1x8x8xf32, #tpu.memory_space<vmem>>, %arg9: memref<1x3x8x8xf32, #tpu.memory_space<vmem>>, %arg10: memref<1x1x8x8xf32, #tpu.memory_space<vmem>>, %arg11: memref<1x3x8x8xf32, #tpu.memory_space<vmem>>) attributes {dimension_semantics = [#tpu.dimension_semantics<parallel>, #tpu.dimension_semantics<parallel>], iteration_bounds = array<i64: 2, 4>, scalar_prefetch = 0 : i64, scratch_operands = 0 : i64, tpu.core_type = #tpu.core_type<tc>, window_params = [{transform_indices = @transform_0, window_bounds = array<i64: 1, 1, 16, 16>}, {transform_indices = @transform_1, window_bounds = array<i64: 1, 1, 16, 16>}, {pipeline_mode = #tpu.pipeline_mode<synchronous>, transform_indices = @transform_2, window_bounds = array<i64: 16, 8>}, {pipeline_mode = #tpu.pipeline_mode<synchronous>, transform_indices = @transform_3, window_bounds = array<i64: 16, 8>}, {pipeline_mode = #tpu.pipeline_mode<synchronous>, transform_indices = @transform_4, window_bounds = array<i64: 8, 16>}, {pipeline_mode = #tpu.pipeline_mode<synchronous>, transform_indices = @transform_5, window_bounds = array<i64: 8, 16>}, {transform_indices = @transform_6, window_bounds = array<i64: 1, 1, 8, 8>}, {transform_indices = @transform_7, window_bounds = array<i64: 1, 3, 8, 8>}, {transform_indices = @transform_8, window_bounds = array<i64: 1, 1, 8, 8>}, {transform_indices = @transform_9, window_bounds = array<i64: 1, 3, 8, 8>}]} {
    %c0 = arith.constant 0 : index
    %c0_0 = arith.constant 0 : index
    %0 = vector.load %arg4[%c0, %c0_0] : memref<16x8xf32, #tpu.memory_space<vmem>>, vector<16x8xf32>
    %c0_1 = arith.constant 0 : index
    %c0_2 = arith.constant 0 : index
    %1 = vector.load %arg5[%c0_1, %c0_2] : memref<16x8xf32, #tpu.memory_space<vmem>>, vector<16x8xf32>
    %c0_3 = arith.constant 0 : index
    %c0_4 = arith.constant 0 : index
    %2 = vector.load %arg6[%c0_3, %c0_4] : memref<8x16xf32, #tpu.memory_space<vmem>>, vector<8x16xf32>
    %c0_5 = arith.constant 0 : index
    %c0_6 = arith.constant 0 : index
    %3 = vector.load %arg7[%c0_5, %c0_6] : memref<8x16xf32, #tpu.memory_space<vmem>>, vector<8x16xf32>
    %c0_7 = arith.constant 0 : index
    %c0_8 = arith.constant 0 : index
    %c0_9 = arith.constant 0 : index
    %c0_10 = arith.constant 0 : index
    %4 = vector.load %arg2[%c0_7, %c0_8, %c0_9, %c0_10] : memref<1x1x16x16xf32, #tpu.memory_space<vmem>>, vector<1x1x16x16xf32>
    %5 = vector.shape_cast %4 : vector<1x1x16x16xf32> to vector<16x16xf32>
    %cst = arith.constant dense<0.000000e+00> : vector<16x8xf32>
    %6 = tpu.matmul %5, %0, %cst {dimension_numbers = #tpu.dot_dimension_numbers<[1], [0], [0], [1], [0, 0, 1, 1], [], []>} : vector<16x16xf32>, vector<16x8xf32>, vector<16x8xf32> -> vector<16x8xf32>
    %cst_11 = arith.constant dense<0.000000e+00> : vector<16x8xf32>
    %7 = tpu.matmul %5, %1, %cst_11 {dimension_numbers = #tpu.dot_dimension_numbers<[1], [0], [0], [1], [0, 0, 1, 1], [], []>} : vector<16x16xf32>, vector<16x8xf32>, vector<16x8xf32> -> vector<16x8xf32>
    %cst_12 = arith.constant dense<0.000000e+00> : vector<8x8xf32>
    %8 = tpu.matmul %2, %6, %cst_12 {dimension_numbers = #tpu.dot_dimension_numbers<[1], [0], [0], [1], [0, 0, 1, 1], [], []>} : vector<8x16xf32>, vector<16x8xf32>, vector<8x8xf32> -> vector<8x8xf32>
    %cst_13 = arith.constant 2.500000e-01 : f32
    %9 = vector.broadcast %cst_13 : f32 to vector<8x8xf32>
    %10 = arith.mulf %9, %8 : vector<8x8xf32>
    %c0_14 = arith.constant 0 : index
    %c0_15 = arith.constant 0 : index
    %c0_16 = arith.constant 0 : index
    %c0_17 = arith.constant 0 : index
    %11 = vector.load %arg8[%c0_14, %c0_15, %c0_16, %c0_17] : memref<1x1x8x8xf32, #tpu.memory_space<vmem>>, vector<1x1x8x8xf32>
    %12 = vector.shape_cast %11 : vector<1x1x8x8xf32> to vector<8x8xf32>
    %13 = vector.shape_cast %10 : vector<8x8xf32> to vector<1x1x8x8xf32>
    tpu.vector_store %arg8[%c0_14, %c0_15, %c0_16, %c0_17], %13 {strides = array<i32>} : memref<1x1x8x8xf32, #tpu.memory_space<vmem>>, vector<1x1x8x8xf32>,
    %cst_18 = arith.constant dense<0.000000e+00> : vector<8x8xf32>
    %14 = tpu.matmul %3, %6, %cst_18 {dimension_numbers = #tpu.dot_dimension_numbers<[1], [0], [0], [1], [0, 0, 1, 1], [], []>} : vector<8x16xf32>, vector<16x8xf32>, vector<8x8xf32> -> vector<8x8xf32>
    %cst_19 = arith.constant 2.500000e-01 : f32
    %15 = vector.broadcast %cst_19 : f32 to vector<8x8xf32>
    %16 = arith.mulf %15, %14 : vector<8x8xf32>
    %c0_20 = arith.constant 0 : index
    %c0_21 = arith.constant 0 : index
    %c0_22 = arith.constant 0 : index
    %c0_23 = arith.constant 0 : index
    %17 = vector.load %arg9[%c0_20, %c0_21, %c0_22, %c0_23] : memref<1x3x8x8xf32, #tpu.memory_space<vmem>>, vector<1x1x8x8xf32>
    %18 = vector.shape_cast %17 : vector<1x1x8x8xf32> to vector<8x8xf32>
    %19 = vector.shape_cast %16 : vector<8x8xf32> to vector<1x1x8x8xf32>
    tpu.vector_store %arg9[%c0_20, %c0_21, %c0_22, %c0_23], %19 {strides = array<i32>} : memref<1x3x8x8xf32, #tpu.memory_space<vmem>>, vector<1x1x8x8xf32>,
    %cst_24 = arith.constant dense<0.000000e+00> : vector<8x8xf32>
    %20 = tpu.matmul %2, %7, %cst_24 {dimension_numbers = #tpu.dot_dimension_numbers<[1], [0], [0], [1], [0, 0, 1, 1], [], []>} : vector<8x16xf32>, vector<16x8xf32>, vector<8x8xf32> -> vector<8x8xf32>
    %cst_25 = arith.constant 2.500000e-01 : f32
    %21 = vector.broadcast %cst_25 : f32 to vector<8x8xf32>
    %22 = arith.mulf %21, %20 : vector<8x8xf32>
    %c0_26 = arith.constant 0 : index
    %c1 = arith.constant 1 : index
    %c0_27 = arith.constant 0 : index
    %c0_28 = arith.constant 0 : index
    %23 = vector.load %arg9[%c0_26, %c1, %c0_27, %c0_28] : memref<1x3x8x8xf32, #tpu.memory_space<vmem>>, vector<1x1x8x8xf32>
    %24 = vector.shape_cast %23 : vector<1x1x8x8xf32> to vector<8x8xf32>
    %25 = vector.shape_cast %22 : vector<8x8xf32> to vector<1x1x8x8xf32>
    tpu.vector_store %arg9[%c0_26, %c1, %c0_27, %c0_28], %25 {strides = array<i32>} : memref<1x3x8x8xf32, #tpu.memory_space<vmem>>, vector<1x1x8x8xf32>,
    %cst_29 = arith.constant dense<0.000000e+00> : vector<8x8xf32>
    %26 = tpu.matmul %3, %7, %cst_29 {dimension_numbers = #tpu.dot_dimension_numbers<[1], [0], [0], [1], [0, 0, 1, 1], [], []>} : vector<8x16xf32>, vector<16x8xf32>, vector<8x8xf32> -> vector<8x8xf32>
    %cst_30 = arith.constant 2.500000e-01 : f32
    %27 = vector.broadcast %cst_30 : f32 to vector<8x8xf32>
    %28 = arith.mulf %27, %26 : vector<8x8xf32>
    %c0_31 = arith.constant 0 : index
    %c2 = arith.constant 2 : index
    %c0_32 = arith.constant 0 : index
    %c0_33 = arith.constant 0 : index
    %29 = vector.load %arg9[%c0_31, %c2, %c0_32, %c0_33] : memref<1x3x8x8xf32, #tpu.memory_space<vmem>>, vector<1x1x8x8xf32>
    %30 = vector.shape_cast %29 : vector<1x1x8x8xf32> to vector<8x8xf32>
    %31 = vector.shape_cast %28 : vector<8x8xf32> to vector<1x1x8x8xf32>
    tpu.vector_store %arg9[%c0_31, %c2, %c0_32, %c0_33], %31 {strides = array<i32>} : memref<1x3x8x8xf32, #tpu.memory_space<vmem>>, vector<1x1x8x8xf32>,
    %c0_34 = arith.constant 0 : index
    %c0_35 = arith.constant 0 : index
    %c0_36 = arith.constant 0 : index
    %c0_37 = arith.constant 0 : index
    %32 = vector.load %arg3[%c0_34, %c0_35, %c0_36, %c0_37] : memref<1x1x16x16xf32, #tpu.memory_space<vmem>>, vector<1x1x16x16xf32>
    %33 = vector.shape_cast %32 : vector<1x1x16x16xf32> to vector<16x16xf32>
    %cst_38 = arith.constant dense<0.000000e+00> : vector<16x8xf32>
    %34 = tpu.matmul %33, %0, %cst_38 {dimension_numbers = #tpu.dot_dimension_numbers<[1], [0], [0], [1], [0, 0, 1, 1], [], []>} : vector<16x16xf32>, vector<16x8xf32>, vector<16x8xf32> -> vector<16x8xf32>
    %cst_39 = arith.constant dense<0.000000e+00> : vector<16x8xf32>
    %35 = tpu.matmul %33, %1, %cst_39 {dimension_numbers = #tpu.dot_dimension_numbers<[1], [0], [0], [1], [0, 0, 1, 1], [], []>} : vector<16x16xf32>, vector<16x8xf32>, vector<16x8xf32> -> vector<16x8xf32>
    %cst_40 = arith.constant dense<0.000000e+00> : vector<8x8xf32>
    %36 = tpu.matmul %2, %34, %cst_40 {dimension_numbers = #tpu.dot_dimension_numbers<[1], [0], [0], [1], [0, 0, 1, 1], [], []>} : vector<8x16xf32>, vector<16x8xf32>, vector<8x8xf32> -> vector<8x8xf32>
    %cst_41 = arith.constant 2.500000e-01 : f32
    %37 = vector.broadcast %cst_41 : f32 to vector<8x8xf32>
    %38 = arith.mulf %37, %36 : vector<8x8xf32>
    %c0_42 = arith.constant 0 : index
    %c0_43 = arith.constant 0 : index
    %c0_44 = arith.constant 0 : index
    %c0_45 = arith.constant 0 : index
    %39 = vector.load %arg10[%c0_42, %c0_43, %c0_44, %c0_45] : memref<1x1x8x8xf32, #tpu.memory_space<vmem>>, vector<1x1x8x8xf32>
    %40 = vector.shape_cast %39 : vector<1x1x8x8xf32> to vector<8x8xf32>
    %41 = vector.shape_cast %38 : vector<8x8xf32> to vector<1x1x8x8xf32>
    tpu.vector_store %arg10[%c0_42, %c0_43, %c0_44, %c0_45], %41 {strides = array<i32>} : memref<1x1x8x8xf32, #tpu.memory_space<vmem>>, vector<1x1x8x8xf32>,
    %cst_46 = arith.constant dense<0.000000e+00> : vector<8x8xf32>
    %42 = tpu.matmul %3, %34, %cst_46 {dimension_numbers = #tpu.dot_dimension_numbers<[1], [0], [0], [1], [0, 0, 1, 1], [], []>} : vector<8x16xf32>, vector<16x8xf32>, vector<8x8xf32> -> vector<8x8xf32>
    %cst_47 = arith.constant 2.500000e-01 : f32
    %43 = vector.broadcast %cst_47 : f32 to vector<8x8xf32>
    %44 = arith.mulf %43, %42 : vector<8x8xf32>
    %c0_48 = arith.constant 0 : index
    %c0_49 = arith.constant 0 : index
    %c0_50 = arith.constant 0 : index
    %c0_51 = arith.constant 0 : index
    %45 = vector.load %arg11[%c0_48, %c0_49, %c0_50, %c0_51] : memref<1x3x8x8xf32, #tpu.memory_space<vmem>>, vector<1x1x8x8xf32>
    %46 = vector.shape_cast %45 : vector<1x1x8x8xf32> to vector<8x8xf32>
    %47 = vector.shape_cast %44 : vector<8x8xf32> to vector<1x1x8x8xf32>
    tpu.vector_store %arg11[%c0_48, %c0_49, %c0_50, %c0_51], %47 {strides = array<i32>} : memref<1x3x8x8xf32, #tpu.memory_space<vmem>>, vector<1x1x8x8xf32>,
    %cst_52 = arith.constant dense<0.000000e+00> : vector<8x8xf32>
    %48 = tpu.matmul %2, %35, %cst_52 {dimension_numbers = #tpu.dot_dimension_numbers<[1], [0], [0], [1], [0, 0, 1, 1], [], []>} : vector<8x16xf32>, vector<16x8xf32>, vector<8x8xf32> -> vector<8x8xf32>
    %cst_53 = arith.constant 2.500000e-01 : f32
    %49 = vector.broadcast %cst_53 : f32 to vector<8x8xf32>
    %50 = arith.mulf %49, %48 : vector<8x8xf32>
    %c0_54 = arith.constant 0 : index
    %c1_55 = arith.constant 1 : index
    %c0_56 = arith.constant 0 : index
    %c0_57 = arith.constant 0 : index
    %51 = vector.load %arg11[%c0_54, %c1_55, %c0_56, %c0_57] : memref<1x3x8x8xf32, #tpu.memory_space<vmem>>, vector<1x1x8x8xf32>
    %52 = vector.shape_cast %51 : vector<1x1x8x8xf32> to vector<8x8xf32>
    %53 = vector.shape_cast %50 : vector<8x8xf32> to vector<1x1x8x8xf32>
    tpu.vector_store %arg11[%c0_54, %c1_55, %c0_56, %c0_57], %53 {strides = array<i32>} : memref<1x3x8x8xf32, #tpu.memory_space<vmem>>, vector<1x1x8x8xf32>,
    %cst_58 = arith.constant dense<0.000000e+00> : vector<8x8xf32>
    %54 = tpu.matmul %3, %35, %cst_58 {dimension_numbers = #tpu.dot_dimension_numbers<[1], [0], [0], [1], [0, 0, 1, 1], [], []>} : vector<8x16xf32>, vector<16x8xf32>, vector<8x8xf32> -> vector<8x8xf32>
    %cst_59 = arith.constant 2.500000e-01 : f32
    %55 = vector.broadcast %cst_59 : f32 to vector<8x8xf32>
    %56 = arith.mulf %55, %54 : vector<8x8xf32>
    %c0_60 = arith.constant 0 : index
    %c2_61 = arith.constant 2 : index
    %c0_62 = arith.constant 0 : index
    %c0_63 = arith.constant 0 : index
    %57 = vector.load %arg11[%c0_60, %c2_61, %c0_62, %c0_63] : memref<1x3x8x8xf32, #tpu.memory_space<vmem>>, vector<1x1x8x8xf32>
    %58 = vector.shape_cast %57 : vector<1x1x8x8xf32> to vector<8x8xf32>
    %59 = vector.shape_cast %56 : vector<8x8xf32> to vector<1x1x8x8xf32>
    tpu.vector_store %arg11[%c0_60, %c2_61, %c0_62, %c0_63], %59 {strides = array<i32>} : memref<1x3x8x8xf32, #tpu.memory_space<vmem>>, vector<1x1x8x8xf32>,
    return
  }
  func.func @transform_0(%arg0: i32, %arg1: i32) -> (i32, i32, i32, i32) {
    %c0_i32 = arith.constant 0 : i32
    %c0_i32_0 = arith.constant 0 : i32
    %c0_i32_1 = arith.constant 0 : i32
    return %arg0, %arg1, %c0_i32, %c0_i32_0 : i32, i32, i32, i32
  }
  func.func @transform_1(%arg0: i32, %arg1: i32) -> (i32, i32, i32, i32) {
    %c0_i32 = arith.constant 0 : i32
    %c0_i32_0 = arith.constant 0 : i32
    %c0_i32_1 = arith.constant 0 : i32
    return %arg0, %arg1, %c0_i32, %c0_i32_0 : i32, i32, i32, i32
  }
  func.func @transform_2(%arg0: i32, %arg1: i32) -> (i32, i32) {
    %c0_i32 = arith.constant 0 : i32
    %c0_i32_0 = arith.constant 0 : i32
    %c0_i32_1 = arith.constant 0 : i32
    return %c0_i32, %c0_i32_0 : i32, i32
  }
  func.func @transform_3(%arg0: i32, %arg1: i32) -> (i32, i32) {
    %c0_i32 = arith.constant 0 : i32
    %c0_i32_0 = arith.constant 0 : i32
    %c0_i32_1 = arith.constant 0 : i32
    return %c0_i32, %c0_i32_0 : i32, i32
  }
  func.func @transform_4(%arg0: i32, %arg1: i32) -> (i32, i32) {
    %c0_i32 = arith.constant 0 : i32
    %c0_i32_0 = arith.constant 0 : i32
    %c0_i32_1 = arith.constant 0 : i32
    return %c0_i32, %c0_i32_0 : i32, i32
  }
  func.func @transform_5(%arg0: i32, %arg1: i32) -> (i32, i32) {
    %c0_i32 = arith.constant 0 : i32
    %c0_i32_0 = arith.constant 0 : i32
    %c0_i32_1 = arith.constant 0 : i32
    return %c0_i32, %c0_i32_0 : i32, i32
  }
  func.func @transform_6(%arg0: i32, %arg1: i32) -> (i32, i32, i32, i32) {
    %c0_i32 = arith.constant 0 : i32
    %c0_i32_0 = arith.constant 0 : i32
    %c0_i32_1 = arith.constant 0 : i32
    return %arg0, %arg1, %c0_i32, %c0_i32_0 : i32, i32, i32, i32
  }
  func.func @transform_7(%arg0: i32, %arg1: i32) -> (i32, i32, i32, i32) {
    %c0_i32 = arith.constant 0 : i32
    %c0_i32_0 = arith.constant 0 : i32
    %c0_i32_1 = arith.constant 0 : i32
    return %arg0, %arg1, %c0_i32, %c0_i32_0 : i32, i32, i32, i32
  }
  func.func @transform_8(%arg0: i32, %arg1: i32) -> (i32, i32, i32, i32) {
    %c0_i32 = arith.constant 0 : i32
    %c0_i32_0 = arith.constant 0 : i32
    %c0_i32_1 = arith.constant 0 : i32
    return %arg0, %arg1, %c0_i32, %c0_i32_0 : i32, i32, i32, i32
  }
  func.func @transform_9(%arg0: i32, %arg1: i32) -> (i32, i32, i32, i32) {
    %c0_i32 = arith.constant 0 : i32
    %c0_i32_0 = arith.constant 0 : i32
    %c0_i32_1 = arith.constant 0 : i32
    return %arg0, %arg1, %c0_i32, %c0_i32_0 : i32, i32, i32, i32
  }
}

</mosaic_0001>

<bundles_post_ra>
// kernel: tpu_custom_call.1
= control target key start
LH: loop header
LB: loop body
LE: loop exit
PB: predicated region body
PF: predicated region fallthrough
CT: control target
= control target key end

     0   :  { %s2512_s0 = inlined_call_operand.hbm [shape: f32[2,4,16,16], index: 0, kind: input, shape index: {}]   ;;  %s2513_s1 = inlined_call_operand.hbm [shape: f32[2,4,16,16], index: 1, kind: input, shape index: {}]   ;;  %s2514_s2 = inlined_call_operand.vmem [shape: f32[16,8], index: 2, kind: input, shape index: {}]   ;;  %s2515_s3 = inlined_call_operand.vmem [shape: f32[16,8], index: 3, kind: input, shape index: {}]   ;;  %s2516_s4 = inlined_call_operand.vmem [shape: f32[8,16], index: 4, kind: input, shape index: {}]   ;;  %s2517_s5 = inlined_call_operand.vmem [shape: f32[8,16], index: 5, kind: input, shape index: {}]   ;;  %s2518_s6 = inlined_call_operand.hbm [shape: f32[2,4,8,8], index: 6, kind: output, shape index: {0}]   ;;  %s2519_s7 = inlined_call_operand.vmem [shape: f32[2,12,8,8], index: 7, kind: output, shape index: {1}]   ;;  %s2520_s8 = inlined_call_operand.hbm [shape: f32[2,4,8,8], index: 8, kind: output, shape index: {2}]   ;;  %s2521_s9 = inlined_call_operand.vmem [shape: f32[2,12,8,8], index: 9, kind: output, shape index: {3}]  }
   0x1   :  { %2529 = sst [smem:[#allocation21_spill]] %s2512_s0 }
   0x2   :  { %2530 = sst [smem:[#allocation22_spill]] %s2520_s8 }
   0x3   :  { %2531 = sst [smem:[#allocation23_spill]] %s2521_s9 }
   0x4   :  { %15 = vsyncpa [#allocation3], 0 }
   0x5   :  { %17 = vsyncpa [#allocation3 + $0x1], 0 }
   0x6   :  { %18 = vsyncpa [#allocation6], 0 }
   0x7   :  { %20 = vsyncpa [#allocation6 + $0x1], 0 }
   0x8   :  { %21 = vsyncpa [#allocation4], 0 }
   0x9   :  { %23 = vsyncpa [#allocation4 + $0x1], 0 }
   0xa   :  { %24 = vsyncpa [#allocation9], 0 }
   0xb   :  { %26 = vsyncpa [#allocation9 + $0x1], 0  ;;  %s2174_s30 = smov 0   ;;  %s2176_s10 = smov 0  }
   0xc   :  { %s2178_s11 = smov 0   ;;  %s2180_s12 = smov 0  }
   0xd   :  { %s2182_s13 = smov 0   ;;  %s2184_s14 = smov 0  }
   0xe   :  { %s2186_s15 = smov 0   ;;  %s2188_s16 = smov 0  }
   0xf LB: > { %2532 = sst [smem:[#allocation14_spill]] %s2086_s30  ;;  %s1664_s17 = sadd.s32 4294967295, %s2114_s16   ;;  %s2114_s16 = sphi %s2188_s16, %s32_s16   ;;  %s2110_s15 = sphi %s2186_s15, %s2554_s15   ;;  %s2106_s14 = sphi %s2184_s14, %s2553_s14   ;;  %s2102_s13 = sphi %s2182_s13, %s2552_s13   ;;  %s2098_s12 = sphi %s2180_s12, %s2551_s12   ;;  %s2094_s11 = sphi %s2178_s11, %s2557_s11   ;;  %s2090_s10 = sphi %s2176_s10, %s2556_s10   ;;  %s2086_s30 = sphi %s2174_s30, %s2555_s30  }
  0x10   : > { %2533 = sst [smem:[#allocation15_spill]] %s2106_s14  ;;  %s1665_s18 = sadd.s32 4294967294, %s2114_s16  }
  0x11   : > { %2534 = sst [smem:[#allocation16_spill]] %s2110_s15  ;;  %s41_s19 = sadd.s32 1, %s2106_s14 }
  0x12   : > { %s44_s20 = sadd.s32 1, %s2110_s15  ;;  %p42_p0 = scmp.ge.s32.totalorder %s41_s19, 4 }
  0x13   : > { %s53_s21 = sadd.s32 1, %s2094_s11  ;;  %p60_p1 = scmp.ne.s32.totalorder %s2094_s11, %s2090_s10 }
  0x14   : > { %p61_p2 = scmp.eq.s32.totalorder %s2114_s16, 0  ;;  %s2559_s19 = smov (%p42_p0, %s41_s19), 0 }
  0x15   : > { %2535 = sst [smem:[#allocation17_spill]] %s2559_s19  ;;  %s2561_s20 = smov (!%p42_p0, %s44_s20), %s2110_s15 }
  0x16   : > { %s49_s22 = ssub.s32 %s2106_s14, %s2559_s19  ;;  %p2227_p3 = por %p61_p2, %p60_p1 }
  0x17   : > { %p46_p4 = scmp.ge.s32.totalorder %s2561_s20, 2  ;;  %p66_p5 = scmp.ne.s32.totalorder %s2090_s10, %s2086_s30 }
  0x18   : > { %p67_p6 = scmp.eq.s32.totalorder %s1664_s17, 0  ;;  %p204_p7 = scmp.eq.s32.totalorder %s1664_s17, 7 }
  0x19   : > { %s2563_s20 = smov (%p46_p4, %s2561_s20), 0  ;;  %p210_p10 = scmp.eq.s32.totalorder %s1665_s18, 7 }
  0x1a   : > { %2537 = sst [smem:[#allocation18_spill]] %s2563_s20  ;;  %p2235_p8 = por %p67_p6, %p66_p5 }
  0x1b   : > { %p2239_p9 = por %p204_p7, %p60_p1  ;;  %s48_s26 = ssub.s32 %s2110_s15, %s2563_s20 }
  0x1c   : > { %s50_s27 = sor.u32 %s49_s22, %s48_s26  ;;  %p2245_p12 = por %p210_p10, %p66_p5 }
  0x1d   : > { %p51_p11 = scmp.eq.s32.totalorder %s50_s27, 0  ;;  %p1858_p13 = scmp.lt.s32.totalorder %s2114_s16, 8 }
  0x1e   : > { %s2540_s28 = scalar_select %p2245_p12, 1, 0 }
  0x1f   : > { %s2251_s29 = sand.u32 1, %s2094_s11   ;;  %s1669_s30 = sshll.u32 %s2106_s14, 1 }
  0x20   : > { %2541 = sst [smem:[#allocation19_spill]] %s2540_s28  ;;  %s1668_s19 = sshll.u32 %s2251_s29, 4 }
  0x21   : > { %s2254_s17 = scalar_select %p51_p11, %s2094_s11, %s53_s21  }
  0x22   : > { %s1670_s8 = sshll.u32 %s2110_s15, 3  ;;  %s330_s20 = scalar_lea.vmem [#allocation2], %s1668_s19 }
  0x23   : > { %2542 = sst [smem:[#allocation20_spill]] %s2254_s17  ;;  %s339_s18 = sshll.u32 %s330_s20, 4  ;;  %s340_s18 = int_to_ptr.vmem [resolvable:$true] %s339_s18 }
  0x24   : > { %s336_s22 = sadd.s32 %s1670_s8, %s1669_s30  ;;  %p2263_p0 = pnand %p1858_p13, %p2227_p3 }
  0x25   : > { %s1671_s26 = sshll.u32 %s336_s22, 7  ;;  %s2544_s0 = sld [smem:[#allocation21_spill]] }
  0x26   : > { %s327_s17 = scalar_lea.sflag [#allocation3], %s2251_s29  ;;  %p1930_p1 = pneg %p2263_p0 }
  0x27   : > { %s1941_s15 = scalar_lea.vmem %s340_s18, 256  ;;  %s2116_s8 = smov [#allocation2]  }
  0x28   : > { %p1942_p2 = scmp.ne.s32.totalorder %s340_s18, %s1941_s15  ;;  %s1946_s30 = sshll.u32 %s2116_s8, 4  ;;  %s1947_s30 = int_to_ptr.vmem [resolvable:$false] %s1946_s30 }
  0x29   : > { %s1948_s20 = scalar_lea.vmem %s1947_s30, 512  ;;  %p1949_p3 = scmp.lt.s32.totalorder %s340_s18, %s1947_s30 }
  0x2a   : > { %p1944_p4 = pnand %p1942_p2, %p1930_p1  ;;  %p1950_p6 = scmp.lt.s32.totalorder %s1948_s20, %s1941_s15 }
  0x2b   : > { %s338_s21 = scalar_lea.hbm %s2544_s0, %s1671_s26 }
  0x2c   : > { %p1945_p5 = pneg %p1944_p4  ;;  %p1951_p7 = por %p1950_p6, %p1949_p3 }
  0x2e   : > { %p1952_p10 = pnand %p1951_p7, %p1945_p5 }
  0x30   : > { %1955 = shalt.err (!%p1952_p10)
}
  0x31   : > { %s2117_s9 = smov 128   ;;  %s2118_s23 = smov 8  }
  0x32   : > { %1847 = dma.hbm_to_vmem [thread:$0]  (!%p2263_p0), %s338_s21, 256, %s340_s18, %s327_s17, %s2117_s9, %s2117_s9, %s2118_s23  }
  0x33   : > { %p1676_p11 = scmp.ge.s32.totalorder %s2114_s16, 1  ;;  %p370_p13 = scmp.lt.s32.totalorder %s2114_s16, 9 }
  0x34   : > { %s361_s8 = scalar_lea.hbm %s2513_s1, %s1671_s26  ;;  %s353_s30 = scalar_lea.vmem [#allocation5], %s1668_s19 }
  0x35   : > { %p2280_p2 = pnand %p1676_p11, %p370_p13  ;;  %s362_s20 = sshll.u32 %s353_s30, 4  ;;  %s363_s20 = int_to_ptr.vmem [resolvable:$true] %s362_s20 }
  0x36   : > { %s350_s0 = scalar_lea.sflag [#allocation6], %s2251_s29  ;;  %s1969_s14 = scalar_lea.vmem %s363_s20, 256 }
  0x37   : > { %p1970_p4 = scmp.ne.s32.totalorder %s363_s20, %s1969_s14  ;;  %s2119_s17 = smov [#allocation5]  }
  0x38   : > { %s1974_s18 = sshll.u32 %s2119_s17, 4  ;;  %s1975_s18 = int_to_ptr.vmem [resolvable:$false] %s1974_s18 }
  0x39   : > { %p1972_p5 = pnand %p1970_p4, %p1930_p1  ;;  %s1976_s21 = scalar_lea.vmem %s1975_s18, 512 }
  0x3a   : > { %p1977_p6 = scmp.lt.s32.totalorder %s363_s20, %s1975_s18  ;;  %p1978_p7 = scmp.lt.s32.totalorder %s1976_s21, %s1969_s14 }
  0x3b   : > { %p1973_p3 = pneg %p1972_p5 }
  0x3c   : > { %p1979_p10 = por %p1978_p7, %p1977_p6 }
  0x3e   : > { %p1980_p11 = pnand %p1979_p10, %p1973_p3 }
  0x40   : > { %1983 = shalt.err (!%p1980_p11)
}
  0x41   : > { %1850 = dma.hbm_to_vmem [thread:$0]  (!%p2263_p0), %s361_s8, 256, %s363_s20, %s350_s0, %s2117_s9, %s2117_s9, %s2118_s23  }
  0x42   : > { %374 = sbr.rel (%p2280_p2) target bundleno = 692 (0x2b4), region = 44  ;;  %s2298_s19 = sand.u32 (!%p2280_p2), 1, %s2090_s10  }
  0x43   : > { %s1677_s29 = sshll.u32 (!%p2280_p2), %s2298_s19, 4  ;;  %s377_s26 = scalar_lea.sflag (!%p2280_p2), [#allocation3], %s2298_s19 }
  0x44   : > { %s380_s15 = scalar_lea.vmem (!%p2280_p2), [#allocation2], %s1677_s29 }
  0x47   : > { %2069 = dma.done.wait (%p2235_p8), %s377_s26, 256  }
  0x48   : > { %2071 = vsyncadd (%p2235_p8), %s377_s26, 4294967040  ;;  %s386_s0 = scalar_lea.sflag [#allocation6], %s2298_s19  ;;  %s2307_s14 = scalar_lea.vmem [#allocation5], %s1677_s29 }
  0x49   : > { %2073 = dma.done.wait (%p2235_p8), %s386_s0, 256  }
  0x4a   : > { %2075 = vsyncadd (%p2235_p8), %s386_s0, 4294967040  ;;  %vm480_vm0 = vcmask 130048   ;;  %v473_v0 = vld [vmem:[%s2514_s2 + $0x8] sm:$0xff]  ;;  %v472_v1 = vld [vmem:[%s2514_s2] sm:$0xff]  ;;  %v2120_v6 = vmov 0.0   ;;  %vm2121_vm1 = vmmov 0  }
  0x4b   : > { %v475_v2 = vld [vmem:[%s2515_s3 + $0x8] sm:$0xff]  ;;  %1751 = vmatprep.subr.mxu0 %v473_v0  ;;  %v478_v3 = vld [vmem:[%s380_s15] sm:$0xff]  ;;  %p453_p8 = scmp.lt.s32.totalorder %s2102_s13, 1  ;;  %s452_s29 = smul.u32 3, %s2098_s12  ;;  %vm711_vm2 = vcmask 64512  }
  0x4c   : > { %1758 = vmatprep.subr.mxu1 %v475_v2  ;;  %v474_v4 = vld [vmem:[%s2515_s3] sm:$0xff]  ;;  %1752 = vmatpush3.msra.mxu0 %v473_v0  ;;  %v479_v5 = vld [vmem:[%s380_s15 + $0x8] sm:$0xff]  ;;  %s1705_s8 = sshll.u32 %s2102_s13, 2 }
  0x4d   : > { %1755 = vmatprep.mubr.msk.f32.mxu0 %vm480_vm0, %v478_v3  ;;  %1753 = vmatprep.subr.mxu0 %v472_v1  ;;  %v2338_v8 = vld [vmem:[%s2516_s4] sm:$0xff]  ;;  %v935_v14 = vld [vmem:[%s2307_s14 + $0x8] sm:$0xff]  ;;  %s454_s26 = scalar_select %p453_p8, %s2102_s13, 1 }
  0x4e   : > { %1759 = vmatpush3.msra.mxu1 %v475_v2  ;;  %1754 = vmatpush3.msra.mxu0 %v472_v1  ;;  %v2345_v10 = vld [vmem:[%s2517_s5] sm:$0xff]  ;;  %p455_p0 = scmp.lt.s32.totalorder %s452_s29, 11  ;;  %s2416_s30 = sadd.s32 %s2098_s12, %s1705_s8 }
  0x4f   : > { %1760 = vmatprep.subr.mxu1 %v474_v4  ;;  %1756 = vmatmul.mubr.msk.f32.vlgmr.msra.gmra.mxu0 %vm480_vm0, %v479_v5  ;;  %v934_v13 = vld [vmem:[%s2307_s14] sm:$0xff]  ;;  %s1835_s15 = smul.u32 12, %s454_s26  ;;  %s1679_s14 = sshll.u32 %s2298_s19, 3 }
  0x50   : > { %1761 = vmatpush3.msra.mxu1 %v474_v4  ;;  %1762 = vmatprep.mubr.msk.f32.mxu1 %vm480_vm0, %v478_v3  ;;  %s2565_s29 = smov (!%p455_p0, %s452_s29), 11  ;;  %s2389_s22 = scalar_lea.vmem [#allocation7], %s1679_s14 }
  0x51   : > { %1763 = vmatmul.mubr.msk.f32.vlgmr.msra.gmra.mxu1 %vm480_vm0, %v479_v5  ;;  %1765 = vmatprep.subr.mxu0 %v2120_v6  ;;  %s2378_s0 = sadd.s32 %s1835_s15, %s2565_s29  ;;  %s1706_s20 = sshll.u32 %s2416_s30, 7 }
  0x52   : > { %1772 = vmatprep.subr.mxu1 %v2120_v6  ;;  %1769 = vmatprep.mubr.msk.f32.mxu0 %vm2121_vm1, %v2120_v6  ;;  %s1681_s27 = sshll.u32 %s2378_s0, 3  ;;  %s1421_s24 = sshll.u32 %s2389_s22, 4  ;;  %s1422_s24 = int_to_ptr.vmem [resolvable:$true] %s1421_s24 }
  0x53   : > { %1776 = vmatprep.mubr.msk.f32.mxu1 %vm2121_vm1, %v2120_v6  ;;  %s460_s28 = scalar_lea.vmem %s2519_s7, %s1681_s27  ;;  %s1419_s21 = scalar_lea.hbm %s2518_s6, %s1706_s20 }
  0x54   : > { %s1383_s29 = scalar_lea.sflag [#allocation4], %s2298_s19  ;;  %s1984_s26 = scalar_lea.vmem %s1422_s24, 128 }
  0x55   : > { %p1985_p1 = scmp.ne.s32.totalorder %s1422_s24, %s1984_s26  ;;  %s2122_s15 = smov [#allocation7]  }
  0x56   : > { %s1988_s13 = sshll.u32 %s2122_s15, 4  ;;  %s1989_s13 = int_to_ptr.vmem [resolvable:$false] %s1988_s13 }
  0x57   : > { %p1986_p13 = pnand %p1985_p1, %p2239_p9  ;;  %s1990_s12 = scalar_lea.vmem %s1989_s13, 256 }
  0x58   : > { %p1991_p4 = scmp.lt.s32.totalorder %s1422_s24, %s1989_s13  ;;  %p1992_p5 = scmp.lt.s32.totalorder %s1990_s12, %s1984_s26 }
  0x59   : > { %p1987_p2 = pneg %p1986_p13 }
  0x5a   : > { %p1993_p3 = por %p1992_p5, %p1991_p4 }
  0x5c   : > { %p1994_p6 = pnand %p1993_p3, %p1987_p2 }
 0x10f   : > { %v1757_v7 = vpop.f32.mrf.mxu0 }
 0x110   : > { %1766 = vmatpush3.msra.mxu0 %v1757_v7  ;;  %1773 = vmatpush3.msra.mxu1 %v1757_v7 }
 0x111   : > { %v553_v9 = vpop.f32.mrf.mxu0  ;;  %1767 = vmatprep.subr.mxu0 %v2120_v6  ;;  %1774 = vmatprep.subr.mxu1 %v2120_v6  ;;  %v1764_v11 = vpop.f32.mrf.mxu1 }
 0x112   : > { %1768 = vmatpush3.msra.mxu0 %v553_v9  ;;  %1775 = vmatpush3.msra.mxu1 %v553_v9 }
 0x113   : > { %1770 = vmatmul.mubr.msk.f32.vlgmr.msra.gmra.mxu0 %vm480_vm0, %v2338_v8  ;;  %1779 = vmatprep.subr.mxu0 %v2120_v6  ;;  %v628_v12 = vpop.f32.mrf.mxu1 }
 0x114   : > { %1786 = vmatprep.subr.mxu1 %v2120_v6  ;;  %1777 = vmatmul.mubr.msk.f32.vlgmr.msra.gmra.mxu1 %vm480_vm0, %v2345_v10 }
 0x115   : > { %1780 = vmatpush3.msra.mxu0 %v1764_v11  ;;  %1787 = vmatpush3.msra.mxu1 %v1764_v11 }
 0x116   : > { %1781 = vmatprep.subr.mxu0 %v2120_v6  ;;  %1788 = vmatprep.subr.mxu1 %v2120_v6 }
 0x117   : > { %1782 = vmatpush3.msra.mxu0 %v628_v12  ;;  %1783 = vmatprep.mubr.msk.f32.mxu0 %vm2121_vm1, %v2120_v6 }
 0x118   : > { %1789 = vmatpush3.msra.mxu1 %v628_v12  ;;  %1784 = vmatmul.mubr.msk.f32.vlgmr.msra.gmra.mxu0 %vm480_vm0, %v2338_v8 }
 0x119   : > { %1793 = vmatprep.subr.mxu0 %v473_v0  ;;  %1790 = vmatprep.mubr.msk.f32.mxu1 %vm2121_vm1, %v2120_v6 }
 0x11a   : > { %1794 = vmatpush3.msra.mxu0 %v473_v0  ;;  %1791 = vmatmul.mubr.msk.f32.vlgmr.msra.gmra.mxu1 %vm480_vm0, %v2345_v10 }
 0x11b   : > { %1795 = vmatprep.subr.mxu0 %v472_v1  ;;  %1800 = vmatprep.subr.mxu1 %v475_v2 }
 0x11c   : > { %1796 = vmatpush3.msra.mxu0 %v472_v1  ;;  %1797 = vmatprep.mubr.msk.f32.mxu0 %vm480_vm0, %v934_v13 }
 0x11d   : > { %1801 = vmatpush3.msra.mxu1 %v475_v2  ;;  %1798 = vmatmul.mubr.msk.f32.vlgmr.msra.gmra.mxu0 %vm480_vm0, %v935_v14 }
 0x11e   : > { %1802 = vmatprep.subr.mxu1 %v474_v4  ;;  %1804 = vmatprep.mubr.msk.f32.mxu1 %vm480_vm0, %v934_v13 }
 0x11f   : > { %1803 = vmatpush3.msra.mxu1 %v474_v4  ;;  %1807 = vmatprep.subr.mxu0 %v2120_v6 }
 0x120   : > { %1805 = vmatmul.mubr.msk.f32.vlgmr.msra.gmra.mxu1 %vm480_vm0, %v935_v14  ;;  %1814 = vmatprep.subr.mxu1 %v2120_v6 }
 0x121   : > { %1811 = vmatprep.mubr.msk.f32.mxu0 %vm2121_vm1, %v2120_v6  ;;  %1818 = vmatprep.mubr.msk.f32.mxu1 %vm2121_vm1, %v2120_v6 }
 0x1d3   : > { %v706_v15 = vpop.f32.mrf.mxu0 }
 0x1d4   : > { %v710_v16 = vmul.f32 0.25, %v706_v15  ;;  %v782_v17 = vpop.f32.mrf.mxu1 }
 0x1d5   : > { %v1771_v18 = vpop.f32.mrf.mxu0  ;;  %v786_v19 = vmul.f32 0.25, %v782_v17 }
 0x1d6   : > { %v1778_v20 = vpop.f32.mrf.mxu1  ;;  %712 = vst.msk [vmem:[%s2389_s22] sm:$0xff] %vm711_vm2, %v710_v16 }
 0x1d7   : > { %787 = vst.msk [vmem:[%s460_s28] sm:$0xff] %vm711_vm2, %v786_v19 }
 0x1d8   : > { %v854_v21 = vpop.f32.mrf.mxu0 }
 0x1d9   : > { %v858_v22 = vmul.f32 0.25, %v854_v21 }
 0x1da   : > { %v1785_v23 = vpop.f32.mrf.mxu0  ;;  %v927_v24 = vpop.f32.mrf.mxu1 }
 0x1db   : > { %1690 = vst.msk [vmem:[%s460_s28 + $0x8] sm:$0xff] %vm711_vm2, %v858_v22  ;;  %v931_v25 = vmul.f32 0.25, %v927_v24 }
 0x1dc   : > { %v1792_v26 = vpop.f32.mrf.mxu1 }
 0x1dd   : > { %1692 = vst.msk [vmem:[%s460_s28 + $0x10] sm:$0xff] %vm711_vm2, %v931_v25  ;;  %v1799_v27 = vpop.f32.mrf.mxu0 }
 0x1de   : > { %1808 = vmatpush3.msra.mxu0 %v1799_v27  ;;  %1815 = vmatpush3.msra.mxu1 %v1799_v27 }
 0x1df   : > { %v1008_v28 = vpop.f32.mrf.mxu0  ;;  %1809 = vmatprep.subr.mxu0 %v2120_v6  ;;  %1816 = vmatprep.subr.mxu1 %v2120_v6 }
 0x1e0   : > { %v1806_v29 = vpop.f32.mrf.mxu1  ;;  %1810 = vmatpush3.msra.mxu0 %v1008_v28  ;;  %1817 = vmatpush3.msra.mxu1 %v1008_v28 }
 0x1e1   : > { %1812 = vmatmul.mubr.msk.f32.vlgmr.msra.gmra.mxu0 %vm480_vm0, %v2338_v8  ;;  %1819 = vmatmul.mubr.msk.f32.vlgmr.msra.gmra.mxu1 %vm480_vm0, %v2345_v10 }
 0x1e2   : > { %1821 = vmatprep.subr.mxu0 %v2120_v6  ;;  %1828 = vmatprep.subr.mxu1 %v2120_v6  ;;  %v1083_v30 = vpop.f32.mrf.mxu1 }
 0x1e3   : > { %1822 = vmatpush3.msra.mxu0 %v1806_v29  ;;  %1829 = vmatpush3.msra.mxu1 %v1806_v29 }
 0x1e4   : > { %1823 = vmatprep.subr.mxu0 %v2120_v6  ;;  %1830 = vmatprep.subr.mxu1 %v2120_v6 }
 0x1e5   : > { %1824 = vmatpush3.msra.mxu0 %v1083_v30  ;;  %1825 = vmatprep.mubr.msk.f32.mxu0 %vm2121_vm1, %v2120_v6 }
 0x1e6   : > { %1831 = vmatpush3.msra.mxu1 %v1083_v30  ;;  %1832 = vmatprep.mubr.msk.f32.mxu1 %vm2121_vm1, %v2120_v6 }
 0x1e7   : > { %1826 = vmatmul.mubr.msk.f32.vlgmr.msra.gmra.mxu0 %vm480_vm0, %v2338_v8  ;;  %1833 = vmatmul.mubr.msk.f32.vlgmr.msra.gmra.mxu1 %vm480_vm0, %v2345_v10 }
 0x1e8   : > { %1997 = shalt.err (!%p1994_p6)
}
 0x1e9   : > { %s1998_s9 = scalar_lea.hbm %s1419_s21, 128  ;;  %s2002_s22 = scalar_lea.hbm %s2518_s6, 1024 }
 0x1ea   : > { %p1999_p7 = scmp.ne.s32.totalorder %s1419_s21, %s1998_s9  ;;  %p2003_p8 = scmp.lt.s32.totalorder %s1419_s21, %s2518_s6 }
 0x1eb   : > { %p2004_p0 = scmp.lt.s32.totalorder %s2002_s22, %s1998_s9 }
 0x1ec   : > { %p2000_p10 = pnand %p1999_p7, %p2239_p9 }
 0x1ed   : > { %p2005_p1 = por %p2004_p0, %p2003_p8 }
 0x1ee   : > { %p2001_p11 = pneg %p2000_p10 }
 0x1f0   : > { %p2006_p13 = pnand %p2005_p1, %p2001_p11 }
 0x1f2   : > { %2009 = shalt.err (!%p2006_p13)
}
 0x1f3   : > { %1840 = dma.vmem_to_hbm [thread:$0]  (%p2239_p9), %s1422_s24, 128, %s1419_s21, %s1383_s29  }
 0x1f4   : > { %s440_s18 = scalar_lea.vmem [#allocation8], %s1679_s14  ;;  %s2546_s12 = sld [smem:[#allocation23_spill]] }
 0x1f5   : > { %s1440_s26 = sshll.u32 %s440_s18, 4  ;;  %s2547_s22 = sld [smem:[#allocation22_spill]]  ;;  %s2454_s26 = int_to_ptr.vmem [resolvable:$true] %s1440_s26 }
 0x1f6   : > { %s1397_s0 = scalar_lea.sflag [#allocation9], %s2298_s19  ;;  %s2010_s14 = scalar_lea.vmem %s2454_s26, 128 }
 0x1f7   : > { %p2011_p2 = scmp.ne.s32.totalorder %s2454_s26, %s2010_s14 }
 0x1f9   : > { %p2012_p4 = pnand %p2011_p2, %p2239_p9 }
 0x1fa   : > { %s2445_s9 = scalar_lea.vmem %s2546_s12, %s1681_s27  ;;  %s2123_s27 = smov [#allocation8]  }
 0x1fb   : > { %s2452_s24 = scalar_lea.hbm %s2547_s22, %s1706_s20  ;;  %p2013_p5 = pneg %p2012_p4 }
 0x1fc   : > { %s2014_s30 = sshll.u32 %s2123_s27, 4  ;;  %s2015_s30 = int_to_ptr.vmem [resolvable:$false] %s2014_s30 }
 0x1fd   : > { %s2016_s20 = scalar_lea.vmem %s2015_s30, 256  ;;  %p2017_p3 = scmp.lt.s32.totalorder %s2454_s26, %s2015_s30 }
 0x1fe   : > { %p2018_p6 = scmp.lt.s32.totalorder %s2016_s20, %s2010_s14 }
 0x200   : > { %p2019_p7 = por %p2018_p6, %p2017_p3 }
 0x202   : > { %p2020_p10 = pnand %p2019_p7, %p2013_p5 }
 0x2a1   : > { %v1158_v31 = vpop.f32.mrf.mxu0  ;;  %v1230_v32 = vpop.f32.mrf.mxu1 }
 0x2a2   : > { %v1162_v33 = vmul.f32 0.25, %v1158_v31  ;;  %v1234_v34 = vmul.f32 0.25, %v1230_v32 }
 0x2a3   : > { %v1813_v35 = vpop.f32.mrf.mxu0  ;;  %v1820_v36 = vpop.f32.mrf.mxu1 }
 0x2a4   : > { %1235 = vst.msk [vmem:[%s2445_s9] sm:$0xff] %vm711_vm2, %v1234_v34  ;;  %1163 = vst.msk [vmem:[%s440_s18] sm:$0xff] %vm711_vm2, %v1162_v33 }
 0x2a5   : > { %2023 = shalt.err (!%p2020_p10)
}
 0x2a6   : > { %s2024_s21 = scalar_lea.hbm %s2452_s24, 128  ;;  %s2028_s8 = scalar_lea.hbm %s2547_s22, 1024 }
 0x2a7   : > { %p2025_p11 = scmp.ne.s32.totalorder %s2452_s24, %s2024_s21  ;;  %p2029_p1 = scmp.lt.s32.totalorder %s2452_s24, %s2547_s22 }
 0x2a8   : > { %p2030_p13 = scmp.lt.s32.totalorder %s2028_s8, %s2024_s21 }
 0x2a9   : > { %p2026_p8 = pnand %p2025_p11, %p2239_p9 }
 0x2aa   : > { %p2031_p2 = por %p2030_p13, %p2029_p1 }
 0x2ab   : > { %p2027_p0 = pneg %p2026_p8 }
 0x2ad   : > { %p2032_p4 = pnand %p2031_p2, %p2027_p0 }
 0x2af   : > { %2035 = shalt.err (!%p2032_p4)
}
 0x2b0   : > { %1841 = dma.vmem_to_hbm [thread:$0]  (%p2239_p9), %s2454_s26, 128, %s2452_s24, %s1397_s0   ;;  %v1302_v37 = vpop.f32.mrf.mxu0  ;;  %v1375_v38 = vpop.f32.mrf.mxu1 }
 0x2b1   : > { %v1306_v39 = vmul.f32 0.25, %v1302_v37  ;;  %v1379_v40 = vmul.f32 0.25, %v1375_v38 }
 0x2b2   : > { %v1827_v41 = vpop.f32.mrf.mxu0  ;;  %v1834_v42 = vpop.f32.mrf.mxu1 }
 0x2b3   : > { %1700 = vst.msk [vmem:[%s2445_s9 + $0x8] sm:$0xff] %vm711_vm2, %v1306_v39  ;;  %1702 = vst.msk [vmem:[%s2445_s9 + $0x10] sm:$0xff] %vm711_vm2, %v1379_v40 }
 0x2b4 PF: > { %s2548_s15 = sld [smem:[#allocation14_spill]]  ;;  %p1859_p5 = scmp.ge.s32.totalorder %s2114_s16, 2 }
 0x2b6   : > { %p1852_p3 = pnand %p1859_p5, %p2245_p12 }
 0x2b8   : > { %p1853_p6 = pneg %p1852_p3 }
 0x2ba   : > { %s1456_s25 = sand.u32 1, %s2548_s15  }
 0x2bb   : > { %s1457_s26 = scalar_lea.sflag [#allocation4], %s1456_s25 }
 0x2bc   : > { %2077 = dma.done.wait (%p1853_p6), %s1457_s26, 128  }
 0x2bd   : > { %2079 = vsyncadd (%p1853_p6), %s1457_s26, 4294967168  ;;  %s1478_s12 = scalar_lea.sflag [#allocation9], %s1456_s25 }
 0x2be   : > { %2081 = dma.done.wait (%p1853_p6), %s1478_s12, 128  }
 0x2bf   : > { %2083 = vsyncadd (%p1853_p6), %s1478_s12, 4294967168  ;;  %s32_s16 = sadd.s32 1, %s2114_s16   ;;  %s2550_s9 = sld [smem:[#allocation20_spill]] }
 0x2c0   : > { %p29_p9 = scmp.ge.s32.totalorder %s32_s16, 10   ;;  %s2551_s12 = sld [smem:[#allocation15_spill]] }
 0x2c1   : > { %s2552_s13 = sld [smem:[#allocation16_spill]]  ;;  %s2555_s30 = smov %s2090_s10 }
 0x2c2   : > { %s2553_s14 = sld [smem:[#allocation17_spill]]  ;;  %s2556_s10 = smov %s2094_s11 }
 0x2c3   : > { %s2554_s15 = sld [smem:[#allocation18_spill]]  ;;  %31 = sbr.rel (!%p29_p9) target bundleno = 15 (0xf), region = 147 }
 0x2c5   : > { %s2557_s11 = smov %s2550_s9 }
 0x2c8   :  { %1495 = vsyncpa [#allocation3], 1 }
 0x2c9   :  { %1497 = vsyncpa [#allocation3 + $0x1], 1 }
 0x2ca   :  { %1498 = vsyncpa [#allocation6], 1 }
 0x2cb   :  { %1500 = vsyncpa [#allocation6 + $0x1], 1 }
 0x2cc   :  { %1501 = vsyncpa [#allocation4], 1 }
 0x2cd   :  { %1503 = vsyncpa [#allocation4 + $0x1], 1 }
 0x2ce   :  { %1504 = vsyncpa [#allocation9], 1 }
 0x2cf   :  { %1506 = vsyncpa [#allocation9 + $0x1], 1 }

</bundles_post_ra>
